<compile_context>
chip_gen: v7x
topology: tpu7x:2x2x1
jax: 0.10.0
libtpu: 0.0.40
codegen_flags: <defaults>
</compile_context>

<pallas_src>
import math
import jax
import jax.numpy as jnp
from jax import lax
from jax.experimental import pallas as pl
from jax.experimental.pallas import tpu as pltpu


def _make_kernel(K: int, d: int, span: int, pad0: int, t_tile: int, eps: float):
    inv_sqrt2 = 1.0 / math.sqrt(2.0)

    def kernel(x_ref, carry_ref, w_ref, b_ref, g_ref, beta_ref, o_ref, xext_ref):
        # x_ref:     (1, t_tile, C_in)         x.dtype   current time tile
        # carry_ref: (1, max(span,1), C_in)    x.dtype   look-back for t == 0
        # w_ref:     (K, C_in, C_out)          bf16      per-tap conv weights
        # b_ref, g_ref, beta_ref: (1, C_out)   f32       conv bias / LN gamma / LN beta
        # o_ref:     (1, t_tile, C_out)        x.dtype
        # xext_ref:  (pad0 + span + t_tile, C_in) f32 scratch, persists across steps
        t = pl.program_id(1)

        # (Re)seed the look-back at the first time tile of every batch.  For the
        # causal case carry_init is zeros == the causal left pad.
        if span > 0:
            @pl.when(t == 0)
            def _init_lookback():
                xext_ref[pad0:pad0 + span, :] = carry_ref[0].astype(jnp.float32)

        # Current tile goes after the look-back (offset pad0+span is 8-aligned).
        xext_ref[pad0 + span:pad0 + span + t_tile, :] = x_ref[0].astype(jnp.float32)

        # Dilated conv: K small MXU matmuls, bf16 operands, f32 accumulation.
        acc = jnp.dot(xext_ref[pad0:pad0 + t_tile, :].astype(jnp.bfloat16),
                      w_ref[0], preferred_element_type=jnp.float32)
        for k in range(1, K):
            off = pad0 + k * d
            acc = acc + jnp.dot(
                xext_ref[off:off + t_tile, :].astype(jnp.bfloat16),
                w_ref[k], preferred_element_type=jnp.float32)
        acc = acc + b_ref[...]

        # LayerNorm over the true (unpadded) channel axis, all in f32.
        mean = jnp.mean(acc, axis=-1, keepdims=True)
        cent = acc - mean
        var = jnp.mean(cent * cent, axis=-1, keepdims=True)
        y = cent * lax.rsqrt(var + eps)
        y = y * g_ref[...] + beta_ref[...]

        # Exact (erf-based) GELU, matching torch.nn.GELU() default.
        y = 0.5 * y * (1.0 + lax.erf(y * inv_sqrt2))

        # Dropout: identity at inference.  Rows past T in a partial last tile are
        # garbage in-flight but are discarded by the partial-block writeback.
        o_ref[0] = y.astype(o_ref.dtype)

        # Roll this tile's tail into the look-back slot for the next time tile.
        if span > 0:
            @pl.when(t + 1 < pl.num_programs(1))
            def _carry_tail():
                xext_ref[pad0:pad0 + span, :] = \
                    xext_ref[pad0 + t_tile:pad0 + t_tile + span, :]

    return kernel


def temporal_conv_layer(x, conv_w, conv_b, ln_w, ln_b, *,
                        kernel_size=3, dilation=1, causal=True, eps=1e-5,
                        t_tile=None):
    """x: [B, T, C_in].  conv_w: [C_out, C_in, K] (PyTorch Conv1d layout)."""
    B, T, C_in = x.shape
    C_out = conv_w.shape[0]
    K = int(kernel_size)
    d = int(dilation)
    assert conv_w.shape == (C_out, C_in, K)
    span = (K - 1) * d

    # --- Reduce both variants to one "causal on z with seeded look-back" kernel.
    if causal or span == 0:
        z = x                                                    # zero wrapper passes
        carry_init = jnp.zeros((B, max(span, 1), C_in), x.dtype)
    else:
        # PyTorch's non-causal branch only preserves seq_len when span is even.
        assert span % 2 == 0, "non-causal requires (K-1)*dilation to be even"
        left = span // 2
        z = jnp.concatenate(
            [x[:, left:, :], jnp.zeros((B, left, C_in), x.dtype)], axis=1)
        carry_init = jnp.concatenate(
            [jnp.zeros((B, left, C_in), x.dtype), x[:, :left, :]], axis=1)

    # Per-tap weights [C_out, C_in, K] -> [K, C_in, C_out]; bf16 for the MXU.
    w = jnp.transpose(conv_w, (2, 1, 0)).astype(jnp.bfloat16)
    b2 = conv_b.astype(jnp.float32).reshape(1, C_out)
    g2 = ln_w.astype(jnp.float32).reshape(1, C_out)
    beta2 = ln_b.astype(jnp.float32).reshape(1, C_out)

    # --- Time tiling: keep double-buffered in/out blocks + f32 intermediates
    #     well under the 32 MiB scoped-VMEM limit (safe on v5e/v6e/v7x).
    itemsize = jnp.dtype(x.dtype).itemsize
    if t_tile is None:
        per_row = (2 * itemsize * C_in          # double-buffered input block
                   + 2 * itemsize * C_out       # double-buffered output block
                   + 4 * C_in                   # x_ext scratch (f32)
                   + 16 * C_out)                # ~4 f32 intermediates (acc/cent/y)
        t_tile = 1024                           # review: no benefit past ~1024 rows
        while t_tile > 64 and t_tile * per_row > 20 * 1024 * 1024:
            t_tile //= 2
    t_tile = int(t_tile)
    if t_tile >= T or span > t_tile:
        t_tile = T                              # single full-extent time block
    else:
        t_tile = max(8, (t_tile // 8) * 8)      # sublane-aligned blocks
    nT = pl.cdiv(T, t_tile)
    pad0 = (-span) % 8                          # align the current-tile store
    span_c = max(span, 1)

    kernel = _make_kernel(K, d, span, pad0, t_tile, eps)

    cost = pl.CostEstimate(
        flops=2 * B * T * K * C_in * C_out,
        transcendentals=B * T * (C_out + 2),
        bytes_accessed=(B * T * C_in * itemsize            # input, read once
                        + B * T * C_out * itemsize         # output, written once
                        + K * C_in * C_out * 2 + 3 * C_out * 4))

    out = pl.pallas_call(
        kernel,
        out_shape=jax.ShapeDtypeStruct((B, T, C_out), x.dtype),
        grid_spec=pltpu.PrefetchScalarGridSpec(
            num_scalar_prefetch=0,
            grid=(B, nT),                       # batch outer (parallel), time inner (carry)
            in_specs=[
                pl.BlockSpec((1, t_tile, C_in), lambda b, t: (b, t, 0)),
                pl.BlockSpec((1, span_c, C_in), lambda b, t: (b, 0, 0)),
                # Constant block indices -> params stay VMEM-resident.
                pl.BlockSpec((K, C_in, C_out), lambda b, t: (0, 0, 0)),
                pl.BlockSpec((1, C_out), lambda b, t: (0, 0)),
                pl.BlockSpec((1, C_out), lambda b, t: (0, 0)),
                pl.BlockSpec((1, C_out), lambda b, t: (0, 0)),
            ],
            out_specs=pl.BlockSpec((1, t_tile, C_out), lambda b, t: (b, t, 0)),
            scratch_shapes=[pltpu.VMEM((pad0 + span + t_tile, C_in), jnp.float32)],
        ),
        compiler_params=pltpu.CompilerParams(
            dimension_semantics=("parallel", "arbitrary"),
            vmem_limit_bytes=32 * 1024 * 1024,
        ),
        cost_estimate=cost,
    )(z, carry_init, w, b2, g2, beta2)

    return out                                  # (B, T, C_out), x.dtype — no post passes


def _reference(x, conv_w, conv_b, ln_w, ln_b, *, kernel_size, dilation, causal,
               eps=1e-5, quantize_bf16=True):
    """Pure-JAX reference.  quantize_bf16 mirrors the kernel's bf16 matmul operands."""
    if quantize_bf16:
        x = x.astype(jnp.bfloat16).astype(jnp.float32)
        conv_w = conv_w.astype(jnp.bfloat16).astype(jnp.float32)
    B, T, C_in = x.shape
    C_out = conv_w.shape[0]
    K, d = kernel_size, dilation
    span = (K - 1) * d
    left = span if causal else span // 2
    xp = jnp.pad(x, ((0, 0), (left, span - left), (0, 0)))
    y = jnp.zeros((B, T, C_out), jnp.float32)
    for k in range(K):
        xs = lax.dynamic_slice_in_dim(xp, k * d, T, axis=1)
        y = y + jnp.einsum("btc,oc->bto", xs, conv_w[:, :, k])
    y = y + conv_b
    mean = jnp.mean(y, axis=-1, keepdims=True)
    var = jnp.mean((y - mean) ** 2, axis=-1, keepdims=True)
    y = (y - mean) * lax.rsqrt(var + eps) * ln_w + ln_b
    return 0.5 * y * (1.0 + lax.erf(y / math.sqrt(2.0)))


if __name__ == "__main__":
    # x is [batch, seq_len, in_channels]; T=32 with t_tile=16 exercises the
    # cross-tile carry path (2 time tiles per batch).
    B, T, C_in, C_out = 2, 32, 8, 16
    K, dilation = 3, 2

    key = jax.random.PRNGKey(0)
    kx, kw, kb, kg, kbeta = jax.random.split(key, 5)

    x = jax.random.normal(kx, (B, T, C_in), dtype=jnp.float32)

    # PyTorch Conv1d-style uniform init bound.
    fan_in = C_in * K
    bound = 1.0 / math.sqrt(fan_in)
    conv_w = jax.random.uniform(kw, (C_out, C_in, K), jnp.float32, -bound, bound)
    conv_b = jax.random.uniform(kb, (C_out,), jnp.float32, -bound, bound)
    ln_w = 1.0 + 0.1 * jax.random.normal(kg, (C_out,), jnp.float32)
    ln_b = 0.1 * jax.random.normal(kbeta, (C_out,), jnp.float32)

    # Causal (module default).
    out = temporal_conv_layer(x, conv_w, conv_b, ln_w, ln_b,
                              kernel_size=K, dilation=dilation, causal=True,
                              t_tile=16)
    out = jax.block_until_ready(out)
    ref = _reference(x, conv_w, conv_b, ln_w, ln_b,
                     kernel_size=K, dilation=dilation, causal=True)
    assert out.shape == (B, T, C_out)
    assert out.dtype == x.dtype
    assert jnp.allclose(out, ref, atol=3e-3, rtol=3e-3), "causal mismatch vs reference"

    # Non-causal branch of the module.
    out_nc = temporal_conv_layer(x, conv_w, conv_b, ln_w, ln_b,
                                 kernel_size=K, dilation=dilation, causal=False,
                                 t_tile=16)
    out_nc = jax.block_until_ready(out_nc)
    ref_nc = _reference(x, conv_w, conv_b, ln_w, ln_b,
                        kernel_size=K, dilation=dilation, causal=False)
    assert jnp.allclose(out_nc, ref_nc, atol=3e-3, rtol=3e-3), "non-causal mismatch"

    print("KERNEL_OK")
</pallas_src>

<mosaic_0001>
module attributes {stable_mosaic.version = 11 : i64} {
  func.func @kernel(%arg0: i32, %arg1: i32, %arg2: memref<1x16x8xf32, #tpu.memory_space<vmem>>, %arg3: memref<1x4x8xf32, #tpu.memory_space<vmem>>, %arg4: memref<3x8x16xbf16, #tpu.memory_space<vmem>>, %arg5: memref<1x16xf32, #tpu.memory_space<vmem>>, %arg6: memref<1x16xf32, #tpu.memory_space<vmem>>, %arg7: memref<1x16xf32, #tpu.memory_space<vmem>>, %arg8: memref<1x16x16xf32, #tpu.memory_space<vmem>>, %arg9: memref<24x8xf32, #tpu.memory_space<vmem>>) attributes {dimension_semantics = [#tpu.dimension_semantics<parallel>, #tpu.dimension_semantics<arbitrary>], iteration_bounds = array<i64: 2, 2>, scalar_prefetch = 0 : i64, scratch_operands = 1 : i64, tpu.core_type = #tpu.core_type<tc>, window_params = [{transform_indices = @transform_0, window_bounds = array<i64: 1, 16, 8>}, {transform_indices = @transform_1, window_bounds = array<i64: 1, 4, 8>}, {pipeline_mode = #tpu.pipeline_mode<synchronous>, transform_indices = @transform_2, window_bounds = array<i64: 3, 8, 16>}, {pipeline_mode = #tpu.pipeline_mode<synchronous>, transform_indices = @transform_3, window_bounds = array<i64: 1, 16>}, {pipeline_mode = #tpu.pipeline_mode<synchronous>, transform_indices = @transform_4, window_bounds = array<i64: 1, 16>}, {pipeline_mode = #tpu.pipeline_mode<synchronous>, transform_indices = @transform_5, window_bounds = array<i64: 1, 16>}, {transform_indices = @transform_6, window_bounds = array<i64: 1, 16, 16>}]} {
    %c0_i32 = arith.constant 0 : i32
    %0 = arith.cmpi eq, %arg1, %c0_i32 : i32
    %1 = arith.extui %0 : i1 to i32
    %c0_i32_0 = arith.constant 0 : i32
    %2 = arith.cmpi ne, %1, %c0_i32_0 : i32
    scf.if %2 {
      %c0_35 = arith.constant 0 : index
      %c0_36 = arith.constant 0 : index
      %c0_37 = arith.constant 0 : index
      %63 = vector.load %arg3[%c0_35, %c0_36, %c0_37] : memref<1x4x8xf32, #tpu.memory_space<vmem>>, vector<1x4x8xf32>
      %64 = vector.shape_cast %63 : vector<1x4x8xf32> to vector<4x8xf32>
      %c4_38 = arith.constant 4 : index
      %c0_39 = arith.constant 0 : index
      %65 = vector.load %arg9[%c4_38, %c0_39] : memref<24x8xf32, #tpu.memory_space<vmem>>, vector<4x8xf32>
      tpu.vector_store %arg9[%c4_38, %c0_39], %64 {strides = array<i32>} : memref<24x8xf32, #tpu.memory_space<vmem>>, vector<4x8xf32>,
    } else {
    }
    %c0 = arith.constant 0 : index
    %c0_1 = arith.constant 0 : index
    %c0_2 = arith.constant 0 : index
    %3 = vector.load %arg2[%c0, %c0_1, %c0_2] : memref<1x16x8xf32, #tpu.memory_space<vmem>>, vector<1x16x8xf32>
    %4 = vector.shape_cast %3 : vector<1x16x8xf32> to vector<16x8xf32>
    %c8 = arith.constant 8 : index
    %c0_3 = arith.constant 0 : index
    %5 = vector.load %arg9[%c8, %c0_3] : memref<24x8xf32, #tpu.memory_space<vmem>>, vector<16x8xf32>
    tpu.vector_store %arg9[%c8, %c0_3], %4 {strides = array<i32>} : memref<24x8xf32, #tpu.memory_space<vmem>>, vector<16x8xf32>,
    %c4 = arith.constant 4 : index
    %c0_4 = arith.constant 0 : index
    %6 = vector.load %arg9[%c4, %c0_4] : memref<24x8xf32, #tpu.memory_space<vmem>>, vector<16x8xf32>
    %7 = arith.truncf %6 : vector<16x8xf32> to vector<16x8xbf16>
    %c0_5 = arith.constant 0 : index
    %c0_6 = arith.constant 0 : index
    %c0_7 = arith.constant 0 : index
    %8 = vector.load %arg4[%c0_5, %c0_6, %c0_7] : memref<3x8x16xbf16, #tpu.memory_space<vmem>>, vector<1x8x16xbf16>
    %9 = vector.shape_cast %8 : vector<1x8x16xbf16> to vector<8x16xbf16>
    %cst = arith.constant dense<0.000000e+00> : vector<16x16xf32>
    %10 = tpu.matmul %7, %9, %cst {dimension_numbers = #tpu.dot_dimension_numbers<[1], [0], [0], [1], [0, 0, 1, 1], [], []>} : vector<16x8xbf16>, vector<8x16xbf16>, vector<16x16xf32> -> vector<16x16xf32>
    %c6 = arith.constant 6 : index
    %c0_8 = arith.constant 0 : index
    %11 = vector.load %arg9[%c6, %c0_8] : memref<24x8xf32, #tpu.memory_space<vmem>>, vector<16x8xf32>
    %12 = arith.truncf %11 : vector<16x8xf32> to vector<16x8xbf16>
    %c1 = arith.constant 1 : index
    %c0_9 = arith.constant 0 : index
    %c0_10 = arith.constant 0 : index
    %13 = vector.load %arg4[%c1, %c0_9, %c0_10] : memref<3x8x16xbf16, #tpu.memory_space<vmem>>, vector<1x8x16xbf16>
    %14 = vector.shape_cast %13 : vector<1x8x16xbf16> to vector<8x16xbf16>
    %cst_11 = arith.constant dense<0.000000e+00> : vector<16x16xf32>
    %15 = tpu.matmul %12, %14, %cst_11 {dimension_numbers = #tpu.dot_dimension_numbers<[1], [0], [0], [1], [0, 0, 1, 1], [], []>} : vector<16x8xbf16>, vector<8x16xbf16>, vector<16x16xf32> -> vector<16x16xf32>
    %16 = arith.addf %10, %15 : vector<16x16xf32>
    %c8_12 = arith.constant 8 : index
    %c0_13 = arith.constant 0 : index
    %17 = vector.load %arg9[%c8_12, %c0_13] : memref<24x8xf32, #tpu.memory_space<vmem>>, vector<16x8xf32>
    %18 = arith.truncf %17 : vector<16x8xf32> to vector<16x8xbf16>
    %c2 = arith.constant 2 : index
    %c0_14 = arith.constant 0 : index
    %c0_15 = arith.constant 0 : index
    %19 = vector.load %arg4[%c2, %c0_14, %c0_15] : memref<3x8x16xbf16, #tpu.memory_space<vmem>>, vector<1x8x16xbf16>
    %20 = vector.shape_cast %19 : vector<1x8x16xbf16> to vector<8x16xbf16>
    %cst_16 = arith.constant dense<0.000000e+00> : vector<16x16xf32>
    %21 = tpu.matmul %18, %20, %cst_16 {dimension_numbers = #tpu.dot_dimension_numbers<[1], [0], [0], [1], [0, 0, 1, 1], [], []>} : vector<16x8xbf16>, vector<8x16xbf16>, vector<16x16xf32> -> vector<16x16xf32>
    %22 = arith.addf %16, %21 : vector<16x16xf32>
    %c0_17 = arith.constant 0 : index
    %c0_18 = arith.constant 0 : index
    %23 = vector.load %arg5[%c0_17, %c0_18] : memref<1x16xf32, #tpu.memory_space<vmem>>, vector<1x16xf32>
    %24 = vector.broadcast %23 : vector<1x16xf32> to vector<16x16xf32>
    %25 = arith.addf %22, %24 : vector<16x16xf32>
    %cst_19 = arith.constant dense<0.000000e+00> : vector<16xf32>
    %26 = vector.multi_reduction <add>, %25, %cst_19 [1] : vector<16x16xf32> to vector<16xf32>
    %27 = vector.shape_cast %26 : vector<16xf32> to vector<16x1xf32>
    %cst_20 = arith.constant 1.600000e+01 : f32
    %28 = vector.broadcast %cst_20 : f32 to vector<16x1xf32>
    %29 = arith.divf %27, %28 : vector<16x1xf32>
    %30 = vector.broadcast %29 : vector<16x1xf32> to vector<16x16xf32>
    %31 = arith.subf %25, %30 : vector<16x16xf32>
    %32 = arith.mulf %31, %31 : vector<16x16xf32>
    %cst_21 = arith.constant dense<0.000000e+00> : vector<16xf32>
    %33 = vector.multi_reduction <add>, %32, %cst_21 [1] : vector<16x16xf32> to vector<16xf32>
    %34 = vector.shape_cast %33 : vector<16xf32> to vector<16x1xf32>
    %cst_22 = arith.constant 1.600000e+01 : f32
    %35 = vector.broadcast %cst_22 : f32 to vector<16x1xf32>
    %36 = arith.divf %34, %35 : vector<16x1xf32>
    %cst_23 = arith.constant 9.99999974E-6 : f32
    %37 = vector.broadcast %cst_23 : f32 to vector<16x1xf32>
    %38 = arith.addf %36, %37 : vector<16x1xf32>
    %39 = math.rsqrt %38 : vector<16x1xf32>
    %40 = vector.broadcast %39 : vector<16x1xf32> to vector<16x16xf32>
    %41 = arith.mulf %31, %40 : vector<16x16xf32>
    %c0_24 = arith.constant 0 : index
    %c0_25 = arith.constant 0 : index
    %42 = vector.load %arg6[%c0_24, %c0_25] : memref<1x16xf32, #tpu.memory_space<vmem>>, vector<1x16xf32>
    %43 = vector.broadcast %42 : vector<1x16xf32> to vector<16x16xf32>
    %44 = arith.mulf %41, %43 : vector<16x16xf32>
    %c0_26 = arith.constant 0 : index
    %c0_27 = arith.constant 0 : index
    %45 = vector.load %arg7[%c0_26, %c0_27] : memref<1x16xf32, #tpu.memory_space<vmem>>, vector<1x16xf32>
    %46 = vector.broadcast %45 : vector<1x16xf32> to vector<16x16xf32>
    %47 = arith.addf %44, %46 : vector<16x16xf32>
    %cst_28 = arith.constant 5.000000e-01 : f32
    %48 = vector.broadcast %cst_28 : f32 to vector<16x16xf32>
    %49 = arith.mulf %48, %47 : vector<16x16xf32>
    %cst_29 = arith.constant 0.707106769 : f32
    %50 = vector.broadcast %cst_29 : f32 to vector<16x16xf32>
    %51 = arith.mulf %47, %50 : vector<16x16xf32>
    %52 = math.erf %51 : vector<16x16xf32>
    %cst_30 = arith.constant 1.000000e+00 : f32
    %53 = vector.broadcast %cst_30 : f32 to vector<16x16xf32>
    %54 = arith.addf %53, %52 : vector<16x16xf32>
    %55 = arith.mulf %49, %54 : vector<16x16xf32>
    %c0_31 = arith.constant 0 : index
    %c0_32 = arith.constant 0 : index
    %c0_33 = arith.constant 0 : index
    %56 = vector.load %arg8[%c0_31, %c0_32, %c0_33] : memref<1x16x16xf32, #tpu.memory_space<vmem>>, vector<1x16x16xf32>
    %57 = vector.shape_cast %56 : vector<1x16x16xf32> to vector<16x16xf32>
    %58 = vector.shape_cast %55 : vector<16x16xf32> to vector<1x16x16xf32>
    tpu.vector_store %arg8[%c0_31, %c0_32, %c0_33], %58 {strides = array<i32>} : memref<1x16x16xf32, #tpu.memory_space<vmem>>, vector<1x16x16xf32>,
    %c1_i32 = arith.constant 1 : i32
    %59 = arith.addi %arg1, %c1_i32 : i32
    %c2_i32 = arith.constant 2 : i32
    %60 = arith.cmpi slt, %59, %c2_i32 : i32
    %61 = arith.extui %60 : i1 to i32
    %c0_i32_34 = arith.constant 0 : i32
    %62 = arith.cmpi ne, %61, %c0_i32_34 : i32
    scf.if %62 {
      %c20 = arith.constant 20 : index
      %c0_35 = arith.constant 0 : index
      %63 = vector.load %arg9[%c20, %c0_35] : memref<24x8xf32, #tpu.memory_space<vmem>>, vector<4x8xf32>
      %c4_36 = arith.constant 4 : index
      %c0_37 = arith.constant 0 : index
      %64 = vector.load %arg9[%c4_36, %c0_37] : memref<24x8xf32, #tpu.memory_space<vmem>>, vector<4x8xf32>
      tpu.vector_store %arg9[%c4_36, %c0_37], %63 {strides = array<i32>} : memref<24x8xf32, #tpu.memory_space<vmem>>, vector<4x8xf32>,
    } else {
    }
    return
  }
  func.func @transform_0(%arg0: i32, %arg1: i32) -> (i32, i32, i32) {
    %c0_i32 = arith.constant 0 : i32
    %c0_i32_0 = arith.constant 0 : i32
    return %arg0, %arg1, %c0_i32 : i32, i32, i32
  }
  func.func @transform_1(%arg0: i32, %arg1: i32) -> (i32, i32, i32) {
    %c0_i32 = arith.constant 0 : i32
    %c0_i32_0 = arith.constant 0 : i32
    %c0_i32_1 = arith.constant 0 : i32
    return %arg0, %c0_i32, %c0_i32_0 : i32, i32, i32
  }
  func.func @transform_2(%arg0: i32, %arg1: i32) -> (i32, i32, i32) {
    %c0_i32 = arith.constant 0 : i32
    %c0_i32_0 = arith.constant 0 : i32
    %c0_i32_1 = arith.constant 0 : i32
    %c0_i32_2 = arith.constant 0 : i32
    return %c0_i32, %c0_i32_0, %c0_i32_1 : i32, i32, i32
  }
  func.func @transform_3(%arg0: i32, %arg1: i32) -> (i32, i32) {
    %c0_i32 = arith.constant 0 : i32
    %c0_i32_0 = arith.constant 0 : i32
    %c0_i32_1 = arith.constant 0 : i32
    return %c0_i32, %c0_i32_0 : i32, i32
  }
  func.func @transform_4(%arg0: i32, %arg1: i32) -> (i32, i32) {
    %c0_i32 = arith.constant 0 : i32
    %c0_i32_0 = arith.constant 0 : i32
    %c0_i32_1 = arith.constant 0 : i32
    return %c0_i32, %c0_i32_0 : i32, i32
  }
  func.func @transform_5(%arg0: i32, %arg1: i32) -> (i32, i32) {
    %c0_i32 = arith.constant 0 : i32
    %c0_i32_0 = arith.constant 0 : i32
    %c0_i32_1 = arith.constant 0 : i32
    return %c0_i32, %c0_i32_0 : i32, i32
  }
  func.func @transform_6(%arg0: i32, %arg1: i32) -> (i32, i32, i32) {
    %c0_i32 = arith.constant 0 : i32
    %c0_i32_0 = arith.constant 0 : i32
    return %arg0, %arg1, %c0_i32 : i32, i32, i32
  }
}

</mosaic_0001>

<bundles_post_ra>
// kernel: tpu_custom_call.1
= control target key start
LH: loop header
LB: loop body
LE: loop exit
PB: predicated region body
PF: predicated region fallthrough
CT: control target
= control target key end

     0   :  { %s831_s21 = smov 0   ;;  %s833_s22 = smov 0   ;;  %s931_s0 = inlined_call_operand.vmem [shape: f32[2,32,8], index: 0, kind: input, shape index: {}]   ;;  %s932_s1 = inlined_call_operand.vmem [shape: f32[2,4,8], index: 1, kind: input, shape index: {}]   ;;  %s933_s2 = inlined_call_operand.vmem [shape: bf16[3,8,16], index: 2, kind: input, shape index: {}]   ;;  %s934_s3 = inlined_call_operand.vmem [shape: f32[1,16], index: 3, kind: input, shape index: {}]   ;;  %s935_s4 = inlined_call_operand.vmem [shape: f32[1,16], index: 4, kind: input, shape index: {}]   ;;  %s936_s5 = inlined_call_operand.vmem [shape: f32[1,16], index: 5, kind: input, shape index: {}]   ;;  %s937_s6 = inlined_call_operand.vmem [shape: f32[2,32,16], index: 6, kind: output, shape index: {}]  }
   0x1   :  { %s835_s23 = smov 0   ;;  %s837_s24 = smov 0  }
   0x2   :  { %s839_s25 = smov 0  }
   0x3 LB: > { %s25_s26 = sadd.s32 1, %s784_s23  ;;  %s28_s27 = sadd.s32 1, %s788_s24  ;;  %s792_s25 = sphi %s839_s25, %s16_s25   ;;  %s788_s24 = sphi %s837_s24, %s941_s24   ;;  %s784_s23 = sphi %s835_s23, %s940_s23   ;;  %s780_s22 = sphi %s833_s22, %s939_s22   ;;  %s776_s21 = sphi %s831_s21, %s938_s21  }
   0x4   : > { %p26_p0 = scmp.ge.s32.totalorder %s25_s26, 2  ;;  %p660_p1 = scmp.ge.s32.totalorder %s792_s25, 1 }
   0x5   : > { %p242_p2 = scmp.lt.s32.totalorder %s792_s25, 5 }
   0x6   : > { %s943_s26 = smov (%p26_p0, %s25_s26), 0  ;;  %s945_s27 = smov (!%p26_p0, %s28_s27), %s788_s24 }
   0x7   : > { %p243_p3 = pnand %p660_p1, %p242_p2  ;;  %p30_p4 = scmp.ge.s32.totalorder %s945_s27, 2 }
   0x8   : > { %s661_s28 = sshll.u32 (!%p243_p3), %s776_s21, 1  ;;  %p285_p5 = scmp.lt.s32.totalorder (!%p243_p3), %s780_s22, 1 }
   0x9   : > { %s947_s27 = smov (%p30_p4, %s945_s27), 0  ;;  %246 = sbr.rel (%p243_p3) target bundleno = 595 (0x253), region = 44 }
   0xa   : > { %p287_p6 = scmp.lt.s32.totalorder (!%p243_p3), %s661_s28, 3  ;;  %p668_p7 = scmp.ne.s32.totalorder (!%p243_p3), %s776_s21, 0 }
  0x10   : > { %s949_s22 = smov (!%p285_p5, %s780_s22), 1  ;;  %s951_s28 = smov (!%p287_p6, %s661_s28), 3 }
  0x11   : > { %s662_s29 = sshll.u32 %s949_s22, 2  ;;  %312 = sbr.rel (%p668_p7) target bundleno = 24 (0x18), region = 48  ;;  %vm314_vm0 = vcmask (!%p668_p7), 60416  }
  0x12   : > { %s290_s30 = sadd.s32 %s662_s29, %s951_s28  ;;  %s297_s9 = scalar_lea.vmem %s932_s1, %s662_s29 }
  0x13   : > { %s663_s10 = sshll.u32 %s290_s30, 3  ;;  %v313_v0 = vld [vmem:[%s297_s9] sm:$0xf] (!%p668_p7) }
  0x14   : > { %s292_s13 = scalar_lea.vmem %s931_s0, %s663_s10  ;;  %s873_s16 = scalar_lea.vmem %s937_s6, %s663_s10  ;;  %315 = vst.msk [vmem:[#allocation2 + $0x4] sm:$0xf] (!%p668_p7), %vm314_vm0, %v313_v0 }
  0x18 PF: > { %v669_v1 = vld [vmem:[%s933_s2 + $0x4] sm:$0xf]  ;;  %vm333_vm1 = vcmask 1043456   ;;  %v324_v2 = vld [vmem:[%s933_s2] sm:$0xf]  ;;  %v794_v3 = vmov 0.0  }
  0x19   : > { %686 = vmatprep.subr.bf16.mxu0 %v794_v3  ;;  %v335_v4 = vsel %vm333_vm1, %v669_v1, 0  ;;  %692 = vmatprep.subr.bf16.mxu1 %v794_v3  ;;  %v382_v5 = vsel %vm333_vm1, %v324_v2, 0  ;;  %v316_v6 = vld [vmem:[%s292_s13] sm:$0xff]  ;;  %v317_v7 = vld [vmem:[%s292_s13 + $0x8] sm:$0xff]  ;;  %vm318_vm2 = vcmask 64512   ;;  %vm795_vm3 = vmmov 0  }
  0x1a   : > { %687 = vmatpush3.bf16.msra.mxu0 %v335_v4  ;;  %693 = vmatpush3.bf16.msra.mxu1 %v382_v5  ;;  %319 = vst.msk [vmem:[#allocation2 + $0x8] sm:$0xff] %vm318_vm2, %v316_v6  ;;  %320 = vst.msk [vmem:[#allocation2 + $0x10] sm:$0xff] %vm318_vm2, %v317_v7  ;;  %v672_v8 = vld [vmem:[%s933_s2 + $0x8] sm:$0xf]  ;;  %v674_v30 = vld [vmem:[%s934_s3] ss:$0 sm:$0xff] }
  0x1b   : > { %688 = vmatprep.mubr.msk.bf16.mxu0 %vm795_vm3, %v794_v3  ;;  %694 = vmatprep.mubr.msk.bf16.mxu1 %vm795_vm3, %v794_v3  ;;  %v434_v14 = vsel %vm333_vm1, %v672_v8, 0  ;;  %vm488_vm4 = vcmask 130048   ;;  %s546_s7 = sadd.s32 1, %s776_s21  ;;  %v675_v57 = vld [vmem:[%s935_s4] ss:$0 sm:$0xff] }
  0x1c   : > { %698 = vmatprep.subr.bf16.mxu0 %v794_v3  ;;  %v676_v59 = vld [vmem:[%s936_s5] ss:$0 sm:$0xff]  ;;  %p677_p8 = scmp.ge.s32.totalorder %s546_s7, 2 }
  0x1d   : > { %vm552_vm5 = vcmask (!%p677_p8), 60416  }
  0x21   : > { %v325_v9 = vld [vmem:[#allocation2 + $0x6] sm:$0xff]  ;;  %v326_v10 = vld [vmem:[#allocation2 + $0xe] sm:$0xff] }
  0x22   : > { %v321_v11 = vld [vmem:[#allocation2 + $0x4] sm:$0xff]  ;;  %v327_v12 = vpack.c.bf16 %v326_v10, %v325_v9  ;;  %v322_v13 = vld [vmem:[#allocation2 + $0xc] sm:$0xff] }
  0x23   : > { %v323_v15 = vpack.c.bf16 %v322_v13, %v321_v11  ;;  %v425_v16 = vld [vmem:[#allocation2 + $0x8] sm:$0xff]  ;;  %v426_v17 = vld [vmem:[#allocation2 + $0x10] sm:$0xff] }
  0x24   : > { %689 = vmatmul.mubr.msk.bf16.vlgmr.msra.gmra.mrb[0].mxu0 %vm318_vm2, %v327_v12  ;;  %v427_v18 = vpack.c.bf16 %v426_v17, %v425_v16  ;;  %v551_v12 = vld [vmem:[#allocation2 + $0x14] sm:$0xf] (!%p677_p8) }
  0x25   : > { %695 = vmatmul.mubr.msk.bf16.vlgmr.msra.gmra.mrb[0].mxu1 %vm318_vm2, %v323_v15  ;;  %699 = vmatpush3.bf16.msra.mxu0 %v434_v14  ;;  %553 = vst.msk [vmem:[#allocation2 + $0x4] sm:$0xf] (!%p677_p8), %vm552_vm5, %v551_v12 }
  0x26   : > { %700 = vmatprep.mubr.msk.bf16.mxu0 %vm795_vm3, %v794_v3 }
  0x2c   : > { %701 = vmatmul.mubr.msk.bf16.vlgmr.msra.gmra.mrb[4].mxu0 %vm318_vm2, %v427_v18 }
  0xf7   : > { %v371_v19 = vpop.f32.mrb[0].mxu0 }
  0xf8   : > { %v418_v20 = vpop.f32.mrb[0].mxu1  ;;  %v690_v21 = vpop.f32.mrb[1].mxu0 }
  0xf9   : > { %v419_v22 = vadd.f32 %v418_v20, %v371_v19  ;;  %v696_v23 = vpop.f32.mrb[1].mxu1  ;;  %v374_v24 = vpop.f32.mrb[2].mxu0 }
  0xfa   : > { %v421_v25 = vpop.f32.mrb[2].mxu1  ;;  %v691_v26 = vpop.f32.mrb[3].mxu0 }
  0xfb   : > { %v422_v27 = vadd.f32 %v421_v25, %v374_v24  ;;  %v697_v28 = vpop.f32.mrb[3].mxu1 }
  0xff   : > { %v470_v29 = vpop.f32.mrb[4].mxu0 }
 0x100   : > { %v477_v31 = vadd.f32 %v470_v29, %v419_v22  ;;  %v702_v32 = vpop.f32.mrb[5].mxu0 }
 0x101   : > { %v473_v33 = vpop.f32.mrb[6].mxu0 }
 0x102   : > { %v478_v34 = vadd.f32 %v473_v33, %v422_v27  ;;  %v703_v35 = vpop.f32.mrb[7].mxu0  ;;  %v486_v36 = vadd.f32 %v674_v30, %v477_v31 }
 0x104   : > { %v489_v37 = vsel %vm488_vm4, %v486_v36, 0.0  ;;  %v487_v38 = vadd.f32 %v674_v30, %v478_v34 }
 0x105   : > { %490 = vadd.xlane.f32.xlu0 %v489_v37 }
 0x106   : > { %v492_v39 = vsel %vm488_vm4, %v487_v38, 0.0 }
 0x109   : > { %493 = vadd.xlane.f32.xlu0 %v492_v39 }
 0x192   : > { %v491_v40 = vpop.xlane.xlu0 %490 }
 0x193   : > { %v496_v41 = vmul.f32 0.0625, %v491_v40 }
 0x195   : > { %v498_v42 = vsub.f32 %v486_v36, %v496_v41 }
 0x196   : > { %v494_v43 = vpop.xlane.xlu0 %493 }
 0x197   : > { %v497_v44 = vmul.f32 0.0625, %v494_v43  ;;  %v500_v45 = vmul.f32 %v498_v42, %v498_v42 }
 0x199   : > { %v499_v46 = vsub.f32 %v487_v38, %v497_v44  ;;  %v502_v47 = vsel %vm488_vm4, %v500_v45, 0.0 }
 0x19a   : > { %503 = vadd.xlane.f32.xlu1 %v502_v47 }
 0x19b   : > { %v501_v48 = vmul.f32 %v499_v46, %v499_v46 }
 0x19d   : > { %v505_v49 = vsel %vm488_vm4, %v501_v48, 0.0 }
 0x19e   : > { %506 = vadd.xlane.f32.xlu1 %v505_v49 }
 0x227   : > { %v504_v50 = vpop.xlane.xlu1 %503 }
 0x228   : > { %v508_v51 = vmul.f32 0.0625, %v504_v50 }
 0x22a   : > { %v510_v52 = vadd.f32 1e-05, %v508_v51 }
 0x22b   : > { %v507_v53 = vpop.xlane.xlu1 %506 }
 0x22c   : > { %746 = vrsqrt.f32 %v510_v52  ;;  %v509_v54 = vmul.f32 0.0625, %v507_v53 }
 0x22e   : > { %v511_v55 = vadd.f32 1e-05, %v509_v54 }
 0x230   : > { %748 = vrsqrt.f32 %v511_v55 }
 0x236   : > { %v747_v56 = vpop.eup %746 }
 0x237   : > { %v514_v58 = vmul.f32 %v747_v56, %v498_v42 }
 0x239   : > { %v523_v60 = vmul.f32 %v675_v57, %v514_v58 }
 0x23a   : > { %v749_v61 = vpop.eup %748 }
 0x23b   : > { %v532_v62 = vadd.f32 %v676_v59, %v523_v60  ;;  %v515_v63 = vmul.f32 %v749_v61, %v499_v46 }
 0x23d   : > { %v536_v0 = vmul.f32 0.70710677, %v532_v62  ;;  %v524_v1 = vmul.f32 %v675_v57, %v515_v63  ;;  %v534_v5 = vmul.f32 0.5, %v532_v62 }
 0x23f   : > { %750 = verf.f32 %v536_v0  ;;  %v533_v2 = vadd.f32 %v676_v59, %v524_v1 }
 0x241   : > { %v537_v3 = vmul.f32 0.70710677, %v533_v2  ;;  %v535_v9 = vmul.f32 0.5, %v533_v2 }
 0x243   : > { %752 = verf.f32 %v537_v3 }
 0x249   : > { %v751_v4 = vpop.eup %750 }
 0x24a   : > { %v540_v6 = vadd.f32 1.0, %v751_v4 }
 0x24c   : > { %v542_v7 = vmul.f32 %v540_v6, %v534_v5  ;;  %550 = sbr.rel (%p677_p8) target bundleno = 595 (0x253), region = 52 }
 0x24d   : > { %v753_v8 = vpop.eup %752 }
 0x24e   : > { %544 = vst.msk [vmem:[%s873_s16] sm:$0xff] %vm488_vm4, %v542_v7  ;;  %v541_v10 = vadd.f32 1.0, %v753_v8 }
 0x250   : > { %v543_v11 = vmul.f32 %v541_v10, %v535_v9 }
 0x252   : > { %545 = vst.msk [vmem:[%s873_s16 + $0x8] sm:$0xff] %vm488_vm4, %v543_v11 }
 0x253 PF: > { %s16_s25 = sadd.s32 1, %s792_s25   ;;  %s938_s21 = smov %s784_s23 }
 0x254   : > { %p13_p9 = scmp.ge.s32.totalorder %s16_s25, 6   ;;  %s939_s22 = smov %s788_s24 }
 0x255   : > { %s940_s23 = smov %s943_s26  ;;  %s941_s24 = smov %s947_s27 }
 0x256   :  { %15 = sbr.rel (!%p13_p9) target bundleno = 3 (0x3), region = 87 }

</bundles_post_ra>
